<compile_context>
chip_gen: v5e
topology: v5e:2x2
jax: 0.10.0
libtpu: 0.0.40
codegen_flags: <defaults>
</compile_context>

<pallas_src>
import jax
import jax.numpy as jnp
from jax.experimental import pallas as pl
from jax.experimental.pallas import tpu as pltpu


# --------------------------------------------------------------------------- kernel

def _linear_kernel(x_ref, w_ref, b_ref, o_ref, acc_ref):
    """One (tb, tc) output tile: acc += x_tile @ w_tile (f32), finalize with bias."""
    k = pl.program_id(2)

    @pl.when(k == 0)
    def _():
        acc_ref[...] = jnp.zeros_like(acc_ref)

    acc_ref[...] += jnp.dot(x_ref[...], w_ref[...],
                            preferred_element_type=jnp.float32)   # MXU, f32 accumulate

    @pl.when(k == pl.num_programs(2) - 1)
    def _():
        o_ref[...] = (acc_ref[...] + b_ref[...]).astype(o_ref.dtype)


# ------------------------------------------------------------------- tiling helpers

def _round_up(x, m):
    return ((x + m - 1) // m) * m


def _pick_feature_tile(c_pad):
    """c_pad is a multiple of 128; prefer 512/256 (256-wide MXU on v6e/v7x)."""
    for tc in (512, 256, 128):
        if c_pad % tc == 0:
            return tc
    return 128


def _pick_k_tile(d):
    """Reduction tile over D. Full-dim block when small or non-128-divisible."""
    if d <= 512:
        return d
    for tk in (512, 256, 128):
        if d % tk == 0:
            return tk
    return d


def _pick_batch_tile(b_pad, tk, tc, x_bytes, out_bytes, budget_bytes):
    """Largest multiple-of-8 divisor of b_pad whose working set fits the VMEM budget,
    preferring >= 2 batch grid steps so v7x's two TensorCores both get work."""
    fixed = tk * tc * 2 + tc * 4                      # W block (bf16) + bias row (f32)
    best = 8
    for tb in (1024, 512, 256, 128, 64, 32, 16, 8):
        if b_pad % tb:
            continue
        need = (fixed
                + 2 * tb * tk * x_bytes               # double-buffered x tiles
                + 2 * tb * tc * out_bytes             # double-buffered out tiles
                + tb * tc * 4)                        # f32 accumulator scratch
        if need <= budget_bytes:
            best = tb
            break
    # v7x megacore: keep at least 2 "parallel" batch steps when possible.
    while best > 8 and b_pad // best < 2:
        best //= 2
    return best


# ----------------------------------------------------------------------- param prep

def prepare_params(weight, bias, *, param_dtype=jnp.bfloat16):
    """One-time parameter prep (hoisted out of the forward path).

    weight: (C, D) nn.Linear weight; bias: (C,).
    Returns (w_t_pad, b_row): (D, C_pad) bf16 pre-transposed weight with C padded to a
    lane-dense multiple of 128, and a (1, C_pad) f32 bias row.
    """
    C, D = weight.shape
    c_pad = max(128, _round_up(C, 128))
    w_t = jnp.zeros((D, c_pad), dtype=param_dtype)
    w_t = w_t.at[:, :C].set(jnp.transpose(weight).astype(param_dtype))
    b_row = jnp.zeros((1, c_pad), dtype=jnp.float32)
    b_row = b_row.at[:, :C].set(bias.astype(jnp.float32))
    return w_t, b_row


# -------------------------------------------------------------------------- forward

def linear_forward(x, w_t_pad, b_row, num_outputs):
    """Pallas equivalent of LinearRegressionLayer.forward / binarized_forward.

    x: (B, D); w_t_pad: (D, C_pad) bf16 (from prepare_params); b_row: (1, C_pad) f32.
    Returns (B, num_outputs) in x.dtype.
    """
    B, D = x.shape
    D_w, c_pad = w_t_pad.shape
    assert D == D_w, f"input_shape mismatch: x has {D}, weight has {D_w}"

    out_dtype = x.dtype
    out_bytes = jnp.zeros((), out_dtype).dtype.itemsize

    # bf16 operands, f32 accumulation inside the kernel.
    x_bf16 = x.astype(jnp.bfloat16)

    # Pad batch to a sublane multiple of 8.
    b_pad = max(8, _round_up(B, 8))
    if b_pad != B:
        x_bf16 = jnp.pad(x_bf16, ((0, b_pad - B), (0, 0)))

    tc = _pick_feature_tile(c_pad)
    tk = _pick_k_tile(D)
    budget = 20 * 1024 * 1024                         # working-set target (all chips)
    tb = _pick_batch_tile(b_pad, tk, tc, 2, out_bytes, budget)

    nb, nj, nk = b_pad // tb, c_pad // tc, pl.cdiv(D, tk)

    # Grid-invariant inputs only need a single VMEM buffer.
    w_mode = pl.Buffered(1) if (nj == 1 and nk == 1) else None
    b_mode = pl.Buffered(1) if nj == 1 else None

    vmem_need = (2 * tb * tk * 2
                 + (1 if w_mode else 2) * tk * tc * 2
                 + (1 if b_mode else 2) * tc * 4
                 + 2 * tb * tc * out_bytes
                 + tb * tc * 4)
    vmem_limit = int(min(48 * 1024 * 1024, max(2 * vmem_need, 8 * 1024 * 1024)))

    out = pl.pallas_call(
        _linear_kernel,
        out_shape=jax.ShapeDtypeStruct((b_pad, c_pad), out_dtype),
        grid_spec=pltpu.PrefetchScalarGridSpec(
            num_scalar_prefetch=0,
            grid=(nb, nj, nk),
            in_specs=[
                pl.BlockSpec((tb, tk), lambda i, j, k: (i, k)),                      # x
                pl.BlockSpec((tk, tc), lambda i, j, k: (k, j), pipeline_mode=w_mode),  # W^T
                pl.BlockSpec((1, tc), lambda i, j, k: (0, j), pipeline_mode=b_mode),   # bias
            ],
            out_specs=pl.BlockSpec((tb, tc), lambda i, j, k: (i, j)),
            scratch_shapes=[pltpu.VMEM((tb, tc), jnp.float32)],
        ),
        compiler_params=pltpu.CompilerParams(
            dimension_semantics=("parallel", "parallel", "arbitrary"),
            vmem_limit_bytes=vmem_limit,
        ),
    )(x_bf16, w_t_pad, b_row)

    return out[:B, :num_outputs]


# ----------------------------------------------------------------------------- main

if __name__ == "__main__":
    # Small shapes consistent with the module: batch=16, input_shape=32, num_outputs=8.
    B, D, C = 16, 32, 8
    key = jax.random.PRNGKey(0)
    kx, kw, kb = jax.random.split(key, 3)

    x = jax.random.uniform(kx, (B, D), dtype=jnp.float32)
    # nn.Linear-style parameters: weight (num_outputs, input_shape), bias (num_outputs,)
    weight = jax.random.uniform(kw, (C, D), dtype=jnp.float32) * 2.0 - 1.0
    bias = jax.random.uniform(kb, (C,), dtype=jnp.float32) * 2.0 - 1.0

    # One-time parameter prep (stored pre-transposed / padded / bf16, not per call).
    w_t_pad, b_row = prepare_params(weight, bias)

    out = linear_forward(x, w_t_pad, b_row, C)
    out = jax.block_until_ready(out)
    assert out.shape == (B, C)

    # Reference with the same bf16-operand / f32-accumulate numerics (tight check).
    ref_bf16 = jnp.dot(x.astype(jnp.bfloat16),
                       jnp.transpose(weight).astype(jnp.bfloat16),
                       preferred_element_type=jnp.float32) + bias[None, :]
    assert jnp.allclose(out, ref_bf16.astype(out.dtype), atol=2e-3, rtol=2e-3)

    # Loose sanity check against the pure-f32 reference (bf16 quantization error only).
    ref_f32 = x @ weight.T + bias[None, :]
    assert jnp.allclose(out, ref_f32, atol=1e-1, rtol=1e-1)

    # binarized_forward(inputs) == forward(inputs) for this layer, so `out` covers both.
    # TODO(synk): clip / compute_l1_norm / compute_l2_norm / calculate_rule_weights are
    # training-time host-side utilities with no forward-pass compute; not kernelized.
    print("KERNEL_OK")
</pallas_src>

<mosaic_0001>
module attributes {stable_mosaic.version = 11 : i64} {
  func.func @_linear_kernel(%arg0: i32, %arg1: i32, %arg2: i32, %arg3: memref<8x32xbf16, #tpu.memory_space<vmem>>, %arg4: memref<32x128xbf16, #tpu.memory_space<vmem>>, %arg5: memref<1x128xf32, #tpu.memory_space<vmem>>, %arg6: memref<8x128xf32, #tpu.memory_space<vmem>>, %arg7: memref<8x128xf32, #tpu.memory_space<vmem>>) attributes {dimension_semantics = [#tpu.dimension_semantics<parallel>, #tpu.dimension_semantics<parallel>, #tpu.dimension_semantics<arbitrary>], iteration_bounds = array<i64: 2, 1, 1>, scalar_prefetch = 0 : i64, scratch_operands = 1 : i64, tpu.core_type = #tpu.core_type<tc>, window_params = [{transform_indices = @transform_0, window_bounds = array<i64: 8, 32>}, {pipeline_mode = #tpu.pipeline_mode<synchronous>, transform_indices = @transform_1, window_bounds = array<i64: 32, 128>}, {pipeline_mode = #tpu.pipeline_mode<synchronous>, transform_indices = @transform_2, window_bounds = array<i64: 1, 128>}, {transform_indices = @transform_3, window_bounds = array<i64: 8, 128>}]} {
    %c0_i32 = arith.constant 0 : i32
    %0 = arith.cmpi eq, %arg2, %c0_i32 : i32
    %1 = arith.extui %0 : i1 to i32
    %c0_i32_0 = arith.constant 0 : i32
    %2 = arith.cmpi ne, %1, %c0_i32_0 : i32
    scf.if %2 {
      %cst_10 = arith.constant 0.000000e+00 : f32
      %12 = vector.broadcast %cst_10 : f32 to vector<8x128xf32>
      %c0_11 = arith.constant 0 : index
      %c0_12 = arith.constant 0 : index
      %13 = vector.load %arg7[%c0_11, %c0_12] : memref<8x128xf32, #tpu.memory_space<vmem>>, vector<8x128xf32>
      tpu.vector_store %arg7[%c0_11, %c0_12], %12 {strides = array<i32>} : memref<8x128xf32, #tpu.memory_space<vmem>>, vector<8x128xf32>,
    } else {
    }
    %c0 = arith.constant 0 : index
    %c0_1 = arith.constant 0 : index
    %3 = vector.load %arg7[%c0, %c0_1] : memref<8x128xf32, #tpu.memory_space<vmem>>, vector<8x128xf32>
    %c0_2 = arith.constant 0 : index
    %c0_3 = arith.constant 0 : index
    %4 = vector.load %arg3[%c0_2, %c0_3] : memref<8x32xbf16, #tpu.memory_space<vmem>>, vector<8x32xbf16>
    %c0_4 = arith.constant 0 : index
    %c0_5 = arith.constant 0 : index
    %5 = vector.load %arg4[%c0_4, %c0_5] : memref<32x128xbf16, #tpu.memory_space<vmem>>, vector<32x128xbf16>
    %cst = arith.constant dense<0.000000e+00> : vector<8x128xf32>
    %6 = tpu.matmul %4, %5, %cst {dimension_numbers = #tpu.dot_dimension_numbers<[1], [0], [0], [1], [0, 0, 1, 1], [], []>} : vector<8x32xbf16>, vector<32x128xbf16>, vector<8x128xf32> -> vector<8x128xf32>
    %7 = arith.addf %3, %6 : vector<8x128xf32>
    %c0_6 = arith.constant 0 : index
    %c0_7 = arith.constant 0 : index
    %8 = vector.load %arg7[%c0_6, %c0_7] : memref<8x128xf32, #tpu.memory_space<vmem>>, vector<8x128xf32>
    tpu.vector_store %arg7[%c0_6, %c0_7], %7 {strides = array<i32>} : memref<8x128xf32, #tpu.memory_space<vmem>>, vector<8x128xf32>,
    %c0_i32_8 = arith.constant 0 : i32
    %9 = arith.cmpi eq, %arg2, %c0_i32_8 : i32
    %10 = arith.extui %9 : i1 to i32
    %c0_i32_9 = arith.constant 0 : i32
    %11 = arith.cmpi ne, %10, %c0_i32_9 : i32
    scf.if %11 {
      %c0_10 = arith.constant 0 : index
      %c0_11 = arith.constant 0 : index
      %12 = vector.load %arg7[%c0_10, %c0_11] : memref<8x128xf32, #tpu.memory_space<vmem>>, vector<8x128xf32>
      %c0_12 = arith.constant 0 : index
      %c0_13 = arith.constant 0 : index
      %13 = vector.load %arg5[%c0_12, %c0_13] : memref<1x128xf32, #tpu.memory_space<vmem>>, vector<1x128xf32>
      %14 = vector.broadcast %13 : vector<1x128xf32> to vector<8x128xf32>
      %15 = arith.addf %12, %14 : vector<8x128xf32>
      %c0_14 = arith.constant 0 : index
      %c0_15 = arith.constant 0 : index
      %16 = vector.load %arg6[%c0_14, %c0_15] : memref<8x128xf32, #tpu.memory_space<vmem>>, vector<8x128xf32>
      tpu.vector_store %arg6[%c0_14, %c0_15], %15 {strides = array<i32>} : memref<8x128xf32, #tpu.memory_space<vmem>>, vector<8x128xf32>,
    } else {
    }
    return
  }
  func.func @transform_0(%arg0: i32, %arg1: i32, %arg2: i32) -> (i32, i32) {
    %c0_i32 = arith.constant 0 : i32
    return %arg0, %arg2 : i32, i32
  }
  func.func @transform_1(%arg0: i32, %arg1: i32, %arg2: i32) -> (i32, i32) {
    %c0_i32 = arith.constant 0 : i32
    return %arg2, %arg1 : i32, i32
  }
  func.func @transform_2(%arg0: i32, %arg1: i32, %arg2: i32) -> (i32, i32) {
    %c0_i32 = arith.constant 0 : i32
    %c0_i32_0 = arith.constant 0 : i32
    return %c0_i32, %arg1 : i32, i32
  }
  func.func @transform_3(%arg0: i32, %arg1: i32, %arg2: i32) -> (i32, i32) {
    %c0_i32 = arith.constant 0 : i32
    return %arg0, %arg1 : i32, i32
  }
}

</mosaic_0001>

<bundles_post_ra>
// kernel: tpu_custom_call.1
= control target key start
LH: loop header
LB: loop body
LE: loop exit
PB: predicated region body
PF: predicated region fallthrough
CT: control target
= control target key end

     0   :  { %8 = vsyncpa [#allocation4], 0  ;;  %s855_s0 = inlined_call_operand.hbm [shape: bf16[16,32], index: 0, kind: input, shape index: {}]   ;;  %s856_s1 = inlined_call_operand.hbm [shape: bf16[32,128], index: 1, kind: input, shape index: {}]   ;;  %s857_s2 = inlined_call_operand.vmem [shape: f32[1,128], index: 2, kind: input, shape index: {}]   ;;  %s858_s3 = inlined_call_operand.hbm [shape: f32[16,128], index: 3, kind: output, shape index: {}]  }
   0x1   :  { %10 = vsyncpa [#allocation4 + $0x1], 0 }
   0x2   :  { %11 = vsyncpa [#allocation7], 0 }
   0x3   :  { %12 = vsyncpa [#allocation5], 0 }
   0x4   :  { %14 = vsyncpa [#allocation5 + $0x1], 0  ;;  %s708_s12 = smov 0   ;;  %s710_s13 = smov 0  }
   0x5   :  { %s712_s14 = smov 0   ;;  %s714_s15 = smov 0  }
   0x6   :  { %s716_s16 = smov 0   ;;  %s718_s17 = smov 0  }
   0x7 LB: > { %s434_s18 = sadd.s32 4294967295, %s683_s17   ;;  %p436_p0 = scmp.ge.s32.totalorder %s683_s17, 1  ;;  %s683_s17 = sphi %s718_s17, %s20_s17   ;;  %s679_s16 = sphi %s716_s16, %s869_s16   ;;  %s675_s15 = sphi %s714_s15, %s868_s15   ;;  %s671_s14 = sphi %s712_s14, %s867_s14   ;;  %s667_s13 = sphi %s710_s13, %s866_s13   ;;  %s663_s12 = sphi %s708_s12, %s865_s12  }
   0x8   : > { %p740_p1 = scmp.eq.s32.totalorder %s434_s18, 0  ;;  %p154_p2 = scmp.lt.s32.totalorder %s683_s17, 3 }
   0x9   : > { %s169_s22 = sshll.u32 %s856_s1, 4  ;;  %s685_s24 = smov [#allocation6]   ;;  %s170_s22 = int_to_ptr.hbm [resolvable:$true] %s169_s22 }
   0xa   : > { %p748_p3 = pnand %p436_p0, %p154_p2  ;;  %s171_s25 = sshll.u32 %s685_s24, 4  ;;  %s172_s25 = int_to_ptr.vmem [resolvable:$true] %s171_s25 }
   0xb   : > { %p439_p6 = scmp.ge.s32.totalorder %s683_s17, 2  ;;  %s686_s26 = smov 64  }
   0xc   : > { %p469_p4 = pneg %p748_p3  ;;  %s687_s27 = smov 4  }
   0xd   : > { %s435_s28 = sadd.s32 4294967294, %s683_s17   ;;  %s39_s29 = sadd.s32 1, %s679_s16 }
   0xe   : > { %p470_p5 = pnand %p469_p4, %p740_p1  ;;  %s48_s30 = sadd.s32 1, %s671_s14 }
   0xf   : > { %p41_p7 = scmp.ge.s32.totalorder %s39_s29, 2  ;;  %p55_p8 = scmp.ne.s32.totalorder %s671_s14, %s667_s13 }
  0x10   : > { %472 = dma.hbm_to_vmem [thread:$0]  (!%p470_p5), %s170_s22, 256, %s172_s25, [#allocation7], %s686_s26, %s686_s26, %s687_s27  }
  0x11   : > { %p56_p9 = scmp.eq.s32.totalorder %s683_s17, 0  ;;  %p61_p10 = scmp.ne.s32.totalorder %s667_s13, %s663_s12 }
  0x12   : > { %s871_s29 = smov (%p41_p7, %s39_s29), 0  ;;  %p141_p13 = scmp.eq.s32.totalorder %s434_s18, 1 }
  0x13   : > { %p767_p11 = por %p56_p9, %p55_p8  ;;  %p773_p12 = por %p740_p1, %p61_p10 }
  0x14   : > { %s43_s6 = ssub.s32 %s679_s16, %s871_s29  ;;  %p147_p2 = scmp.eq.s32.totalorder %s435_s28, 1 }
  0x15   : > { %p46_p0 = scmp.eq.s32.totalorder %s43_s6, 0  ;;  %p779_p4 = por %p141_p13, %p55_p8 }
  0x16   : > { %p482_p5 = scmp.lt.s32.totalorder %s683_s17, 2  ;;  %p787_p7 = por %p147_p2, %p61_p10 }
  0x17   : > { %s785_s8 = scalar_select %p46_p0, %s671_s14, %s48_s30  }
  0x18   : > { %s191_s10 = sand.u32 1, %s671_s14   ;;  %s441_s20 = sshll.u32 %s679_s16, 2 }
  0x19   : > { %s440_s11 = sshll.u32 %s191_s10, 2  ;;  %s200_s18 = scalar_lea.hbm %s855_s0, %s441_s20 }
  0x1a   : > { %s195_s24 = scalar_lea.vmem [#allocation3], %s440_s11  ;;  %s202_s26 = sshll.u32 %s200_s18, 4  ;;  %s203_s26 = int_to_ptr.hbm [resolvable:$true] %s202_s26 }
  0x1b   : > { %s204_s25 = sshll.u32 %s195_s24, 4  ;;  %p474_p8 = pnand %p482_p5, %p767_p11  ;;  %s205_s25 = int_to_ptr.vmem [resolvable:$true] %s204_s25 }
  0x1c   : > { %s192_s27 = scalar_lea.sflag [#allocation4], %s191_s10  ;;  %213 = sbr.rel (%p748_p3) target bundleno = 178 (0xb2), region = 32 }
  0x1d   : > { %476 = dma.hbm_to_vmem [thread:$0]  (!%p474_p8), %s203_s26, 64, %s205_s25, %s192_s27  }
  0x1e   : > { %s801_s28 = sand.u32 (!%p748_p3), 1, %s667_s13  }
  0x1f   : > { %s443_s30 = sshll.u32 (!%p748_p3), %s801_s28, 2  ;;  %s216_s6 = scalar_lea.sflag (!%p748_p3), [#allocation4], %s801_s28 }
  0x20   : > { %s219_s11 = scalar_lea.vmem (!%p748_p3), [#allocation3], %s443_s30 }
  0x21   : > { %650 = dma.done.wait (%p773_p12), %s216_s6, 64  }
  0x22   : > { %652 = vsyncadd (%p773_p12), %s216_s6, 4294967232 }
  0x23   : > { %654 = dma.done.wait (%p740_p1), [#allocation7], 256  }
  0x24   : > { %656 = vsyncadd (%p740_p1), [#allocation7], 4294967040  ;;  %v460_v0 = vld [vmem:[#allocation6 + $0x8] sm:$0xff]  ;;  %v459_v1 = vld [vmem:[#allocation6] sm:$0xff]  ;;  %vm279_vm0 = vcmask 261120   ;;  %s456_s23 = sshll.u32 %s675_s15, 3 }
  0x25   : > { %289 = vmatpush.bf16.msra.mxu0 %v460_v0  ;;  %v262_v2 = vld [vmem:[%s219_s11] sm:$0xf]  ;;  %s445_s4 = sshll.u32 %s801_s28, 3  ;;  %s320_s20 = scalar_lea.hbm %s858_s3, %s456_s23 }
  0x26   : > { %v536_v3 = vld [vmem:[%s857_s2] ss:$0 sm:$0xff]  ;;  %s250_s22 = scalar_lea.vmem [#allocation8], %s445_s4  ;;  %s324_s24 = sshll.u32 %s320_s20, 4  ;;  %s325_s24 = int_to_ptr.hbm [resolvable:$true] %s324_s24 }
  0x27   : > { %s322_s18 = sshll.u32 %s250_s22, 4  ;;  %s309_s25 = scalar_lea.sflag [#allocation5], %s801_s28  ;;  %s323_s18 = int_to_ptr.vmem [resolvable:$true] %s322_s18 }
  0x28   : > { %s611_s15 = sshra.s32 %s325_s24, 4  ;;  %s617_s6 = scalar_lea.hbm %s858_s3, 16  ;;  %s612_s15 = int_to_ptr.hbm [resolvable:$true] %s611_s15 }
  0x29   : > { %290 = vmatpush.bf16.msra.mxu0 %v459_v1  ;;  %s613_s26 = scalar_lea.hbm %s612_s15, 8  ;;  %p618_p10 = scmp.lt.s32.totalorder %s612_s15, %s858_s3 }
  0x2a   : > { %p614_p1 = scmp.ne.s32.totalorder %s612_s15, %s613_s26  ;;  %p619_p11 = scmp.lt.s32.totalorder %s617_s6, %s613_s26 }
  0x2c   : > { %454 = vmatmul.msk.bf16.vlgmr.msra.gmra.mxu0 %vm279_vm0, %v262_v2  ;;  %p615_p3 = pnand %p614_p1, %p779_p4  ;;  %p620_p12 = por %p619_p11, %p618_p10 }
  0x2e   : > { %p616_p9 = pneg %p615_p3 }
  0x30   : > { %p621_p13 = pnand %p620_p12, %p616_p9 }
  0xa9   : > { %v292_v4 = vpop.f32.mrf.mxu0 }
  0xaa   : > { %v306_v5 = vadd.f32 %v536_v3, %v292_v4 }
  0xac   : > { %307 = vst [vmem:[%s250_s22] sm:$0xff] %v306_v5 }
  0xad   : > { %624 = shalt.err (!%p621_p13)
}
  0xae   : > { %467 = dma.vmem_to_hbm [thread:$0]  (%p779_p4), %s323_s18, 128, %s325_s24, %s309_s25  }
  0xb1   : > { %v294_v6 = vpop.f32.mrf.mxu0 }
  0xb2 PF: > { %s336_s28 = sand.u32 1, %s663_s12   ;;  %p478_p0 = pnand %p439_p6, %p787_p7 }
  0xb3   : > { %s337_s4 = scalar_lea.sflag [#allocation5], %s336_s28 }
  0xb4   : > { %p479_p2 = pneg %p478_p0 }
  0xb6   : > { %658 = dma.done.wait (%p479_p2), %s337_s4, 128  }
  0xb7   : > { %660 = vsyncadd (%p479_p2), %s337_s4, 4294967168  ;;  %s20_s17 = sadd.s32 1, %s683_s17   ;;  %s865_s12 = smov %s667_s13 }
  0xb8   : > { %p17_p5 = scmp.ge.s32.totalorder %s20_s17, 4   ;;  %s866_s13 = smov %s671_s14 }
  0xb9   : > { %s867_s14 = smov %s785_s8  ;;  %s868_s15 = smov %s679_s16 }
  0xba   : > { %s869_s16 = smov %s871_s29  ;;  %19 = sbr.rel (!%p17_p5) target bundleno = 7 (0x7), region = 93 }
  0xbf   :  { %343 = vsyncpa [#allocation4], 1 }
  0xc0   :  { %345 = vsyncpa [#allocation4 + $0x1], 1 }
  0xc1   :  { %346 = vsyncpa [#allocation7], 1 }
  0xc2   :  { %347 = vsyncpa [#allocation5], 1 }
  0xc3   :  { %349 = vsyncpa [#allocation5 + $0x1], 1 }

</bundles_post_ra>
